<compile_context>
chip_gen: v6e
topology: v6e:2x2x1
jax: 0.10.0
libtpu: 0.0.40
codegen_flags: <defaults>
</compile_context>

<pallas_src>
import jax
import jax.numpy as jnp
from jax import lax
from jax.experimental import pallas as pl
from jax.experimental.pallas import tpu as pltpu

KH = KW = 4
STRIDE = 2
PAD = 1
NEG_SLOPE = 0.2
EPS = 1e-5


# ----------------------------------------------------------------------------
# Fused Pallas kernel: conv-as-matmul (lane-dense, transposed) + instance norm
# ----------------------------------------------------------------------------
def _conv_in_kernel(a_ref, w_ref, g_ref, b_ref, o_ref):
    """One image per grid step.

    a_ref: (K, S)     bf16 im2col patches of one image, K = Cin*KH*KW, S = Ho*Wo
    w_ref: (Cout, K)  bf16 reshaped conv weight (resident across the grid)
    g_ref: (Cout, 1)  f32 instance-norm gamma
    b_ref: (Cout, 1)  f32 instance-norm beta
    o_ref: (Cout, S)  f32 normalized output (lane axis = spatial)
    """
    # MXU bf16 matmul with f32 accumulation; output is lane-dense (S on lanes).
    y = jnp.dot(w_ref[...], a_ref[...], preferred_element_type=jnp.float32)

    # Instance norm: per-row (= per (n, c)) reduction over the lane axis.
    # (Conv bias omitted on purpose: it cancels exactly in `y - mean`.)
    mean = jnp.mean(y, axis=-1, keepdims=True)
    yc = y - mean
    var = jnp.mean(yc * yc, axis=-1, keepdims=True)        # biased var (PyTorch)
    inv = lax.rsqrt(var + EPS)
    o_ref[...] = (yc * inv * g_ref[...] + b_ref[...]).astype(o_ref.dtype)


# ----------------------------------------------------------------------------
# Host-side glue: LeakyReLU once, pad, static strided-slice patches, one call
# ----------------------------------------------------------------------------
@jax.jit
def _conv_block_share_batched(x_all, conv_w, gamma, beta):
    """x_all: (NB, Cin, H, W) -> (NB, Cout, H//2, W//2). Weights shared."""
    nb, cin, h, w = x_all.shape
    cout = conv_w.shape[0]
    ho = (h + 2 * PAD - KH) // STRIDE + 1
    wo = (w + 2 * PAD - KW) // STRIDE + 1
    k = cin * KH * KW
    s = ho * wo

    # LeakyReLU once per input element (f32), then zero-pad.
    xa = jnp.where(x_all > 0, x_all, NEG_SLOPE * x_all)
    xp = jnp.pad(xa, ((0, 0), (0, 0), (PAD, PAD), (PAD, PAD)))

    # Patches via static strided slices (no advanced-indexing gather).
    # K ordering: ci * (KH*KW) + kh*KW + kw  -- matches conv_w.reshape below.
    cols = [
        xp[:, :, kh:kh + STRIDE * ho:STRIDE, kw:kw + STRIDE * wo:STRIDE]
        for kh in range(KH)
        for kw in range(KW)
    ]
    a = jnp.stack(cols, axis=2).reshape(nb, k, s).astype(jnp.bfloat16)

    wm = conv_w.reshape(cout, k).astype(jnp.bfloat16)       # (Cout, K)
    g2 = gamma.reshape(cout, 1).astype(jnp.float32)
    b2 = beta.reshape(cout, 1).astype(jnp.float32)

    out = pl.pallas_call(
        _conv_in_kernel,
        out_shape=jax.ShapeDtypeStruct((nb, cout, s), jnp.float32),
        grid_spec=pltpu.PrefetchScalarGridSpec(
            num_scalar_prefetch=0,
            grid=(nb,),
            in_specs=[
                # one image's patches per step (leading batch dim squeezed)
                pl.BlockSpec((None, k, s), lambda n: (n, 0, 0)),
                # shared weight / affine params: constant block index -> resident
                pl.BlockSpec((cout, k), lambda n: (0, 0)),
                pl.BlockSpec((cout, 1), lambda n: (0, 0)),
                pl.BlockSpec((cout, 1), lambda n: (0, 0)),
            ],
            out_specs=pl.BlockSpec((None, cout, s), lambda n: (n, 0, 0)),
        ),
        compiler_params=pltpu.CompilerParams(
            dimension_semantics=("parallel",),      # shards images across TCs (v7x)
            # Explicit scoped-VMEM budget; re-derive for very large Ho*Wo / Cin
            # (v7x has 64 MiB/TC physical).
            vmem_limit_bytes=64 * 1024 * 1024,
        ),
    )(a, wm, g2, b2)

    return out.reshape(nb, cout, ho, wo)


def conv_block_share_forward(xs, conv_w, conv_b, gamma, beta):
    """ModuleParallel semantics: shared weights applied to every tensor in xs.

    The whole list is batched into a single pallas_call.  `conv_b` is accepted
    for interface fidelity but unused: InstanceNorm's mean subtraction cancels
    the conv bias exactly.
    """
    del conv_b
    num = len(xs)
    n = xs[0].shape[0]
    x_all = jnp.concatenate(xs, axis=0)
    out_all = _conv_block_share_batched(x_all, conv_w, gamma, beta)
    return [out_all[i * n:(i + 1) * n] for i in range(num)]


# ----------------------------------------------------------------------------
# Pure-JAX reference (bf16-quantized matmul operands, bias kept to show it
# cancels) for correctness check
# ----------------------------------------------------------------------------
def _reference_single(x, conv_w, conv_b, gamma, beta):
    xa = jnp.where(x > 0, x, NEG_SLOPE * x)
    xa = xa.astype(jnp.bfloat16).astype(jnp.float32)
    wq = conv_w.astype(jnp.bfloat16).astype(jnp.float32)
    y = lax.conv_general_dilated(
        xa, wq, window_strides=(STRIDE, STRIDE),
        padding=((PAD, PAD), (PAD, PAD)),
        dimension_numbers=("NCHW", "OIHW", "NCHW"),
    ) + conv_b[None, :, None, None]
    mean = y.mean(axis=(2, 3), keepdims=True)
    var = ((y - mean) ** 2).mean(axis=(2, 3), keepdims=True)
    return (y - mean) * lax.rsqrt(var + EPS) * gamma[None, :, None, None] \
        + beta[None, :, None, None]


# ----------------------------------------------------------------------------
# Main
# ----------------------------------------------------------------------------
if __name__ == "__main__":
    key = jax.random.PRNGKey(0)
    k_x0, k_x1, k_w, k_b, k_g, k_bt = jax.random.split(key, 6)

    N, CIN, H, W = 2, 4, 16, 16
    COUT = 8

    # ModuleParallel input: a list of tensors sharing the same weights.
    x_list = [
        jax.random.normal(k_x0, (N, CIN, H, W), dtype=jnp.float32),
        jax.random.normal(k_x1, (N, CIN, H, W), dtype=jnp.float32),
    ]

    conv_w = jax.random.normal(k_w, (COUT, CIN, KH, KW), dtype=jnp.float32) * 0.1
    conv_b = jax.random.normal(k_b, (COUT,), dtype=jnp.float32) * 0.1
    gamma = 1.0 + 0.1 * jax.random.normal(k_g, (COUT,), dtype=jnp.float32)
    beta = 0.1 * jax.random.normal(k_bt, (COUT,), dtype=jnp.float32)

    outs = conv_block_share_forward(x_list, conv_w, conv_b, gamma, beta)
    outs = [jax.block_until_ready(o) for o in outs]

    for x, o in zip(x_list, outs):
        ref = _reference_single(x, conv_w, conv_b, gamma, beta)
        assert o.shape == (N, COUT, H // 2, W // 2), o.shape
        err = float(jnp.abs(o - ref).max())
        assert err < 2e-3, err

    print("KERNEL_OK")
</pallas_src>

<mosaic_0001>
module attributes {stable_mosaic.version = 11 : i64} {
  func.func @_conv_in_kernel(%arg0: i32, %arg1: memref<1x64x64xbf16, #tpu.memory_space<vmem>>, %arg2: memref<8x64xbf16, #tpu.memory_space<vmem>>, %arg3: memref<8x1xf32, #tpu.memory_space<vmem>>, %arg4: memref<8x1xf32, #tpu.memory_space<vmem>>, %arg5: memref<1x8x64xf32, #tpu.memory_space<vmem>>) attributes {dimension_semantics = [#tpu.dimension_semantics<parallel>], iteration_bounds = array<i64: 4>, scalar_prefetch = 0 : i64, scratch_operands = 0 : i64, tpu.core_type = #tpu.core_type<tc>, window_params = [{transform_indices = @transform_0, window_bounds = array<i64: 1, 64, 64>}, {pipeline_mode = #tpu.pipeline_mode<synchronous>, transform_indices = @transform_1, window_bounds = array<i64: 8, 64>}, {pipeline_mode = #tpu.pipeline_mode<synchronous>, transform_indices = @transform_2, window_bounds = array<i64: 8, 1>}, {pipeline_mode = #tpu.pipeline_mode<synchronous>, transform_indices = @transform_3, window_bounds = array<i64: 8, 1>}, {transform_indices = @transform_4, window_bounds = array<i64: 1, 8, 64>}]} {
    %c0 = arith.constant 0 : index
    %c0_0 = arith.constant 0 : index
    %0 = vector.load %arg2[%c0, %c0_0] : memref<8x64xbf16, #tpu.memory_space<vmem>>, vector<8x64xbf16>
    %c0_1 = arith.constant 0 : index
    %c0_2 = arith.constant 0 : index
    %c0_3 = arith.constant 0 : index
    %1 = vector.load %arg1[%c0_1, %c0_2, %c0_3] : memref<1x64x64xbf16, #tpu.memory_space<vmem>>, vector<1x64x64xbf16>
    %2 = vector.shape_cast %1 : vector<1x64x64xbf16> to vector<64x64xbf16>
    %cst = arith.constant dense<0.000000e+00> : vector<8x64xf32>
    %3 = tpu.matmul %0, %2, %cst {dimension_numbers = #tpu.dot_dimension_numbers<[1], [0], [0], [1], [0, 0, 1, 1], [], []>} : vector<8x64xbf16>, vector<64x64xbf16>, vector<8x64xf32> -> vector<8x64xf32>
    %cst_4 = arith.constant dense<0.000000e+00> : vector<8xf32>
    %4 = vector.multi_reduction <add>, %3, %cst_4 [1] : vector<8x64xf32> to vector<8xf32>
    %5 = vector.shape_cast %4 : vector<8xf32> to vector<8x1xf32>
    %cst_5 = arith.constant 6.400000e+01 : f32
    %6 = vector.broadcast %cst_5 : f32 to vector<8x1xf32>
    %7 = arith.divf %5, %6 : vector<8x1xf32>
    %8 = vector.broadcast %7 : vector<8x1xf32> to vector<8x64xf32>
    %9 = arith.subf %3, %8 : vector<8x64xf32>
    %10 = arith.mulf %9, %9 : vector<8x64xf32>
    %cst_6 = arith.constant dense<0.000000e+00> : vector<8xf32>
    %11 = vector.multi_reduction <add>, %10, %cst_6 [1] : vector<8x64xf32> to vector<8xf32>
    %12 = vector.shape_cast %11 : vector<8xf32> to vector<8x1xf32>
    %cst_7 = arith.constant 6.400000e+01 : f32
    %13 = vector.broadcast %cst_7 : f32 to vector<8x1xf32>
    %14 = arith.divf %12, %13 : vector<8x1xf32>
    %cst_8 = arith.constant 9.99999974E-6 : f32
    %15 = vector.broadcast %cst_8 : f32 to vector<8x1xf32>
    %16 = arith.addf %14, %15 : vector<8x1xf32>
    %17 = math.rsqrt %16 : vector<8x1xf32>
    %18 = vector.broadcast %17 : vector<8x1xf32> to vector<8x64xf32>
    %19 = arith.mulf %9, %18 : vector<8x64xf32>
    %c0_9 = arith.constant 0 : index
    %c0_10 = arith.constant 0 : index
    %20 = vector.load %arg3[%c0_9, %c0_10] : memref<8x1xf32, #tpu.memory_space<vmem>>, vector<8x1xf32>
    %21 = vector.broadcast %20 : vector<8x1xf32> to vector<8x64xf32>
    %22 = arith.mulf %19, %21 : vector<8x64xf32>
    %c0_11 = arith.constant 0 : index
    %c0_12 = arith.constant 0 : index
    %23 = vector.load %arg4[%c0_11, %c0_12] : memref<8x1xf32, #tpu.memory_space<vmem>>, vector<8x1xf32>
    %24 = vector.broadcast %23 : vector<8x1xf32> to vector<8x64xf32>
    %25 = arith.addf %22, %24 : vector<8x64xf32>
    %c0_13 = arith.constant 0 : index
    %c0_14 = arith.constant 0 : index
    %c0_15 = arith.constant 0 : index
    %26 = vector.load %arg5[%c0_13, %c0_14, %c0_15] : memref<1x8x64xf32, #tpu.memory_space<vmem>>, vector<1x8x64xf32>
    %27 = vector.shape_cast %26 : vector<1x8x64xf32> to vector<8x64xf32>
    %28 = vector.shape_cast %25 : vector<8x64xf32> to vector<1x8x64xf32>
    tpu.vector_store %arg5[%c0_13, %c0_14, %c0_15], %28 {strides = array<i32>} : memref<1x8x64xf32, #tpu.memory_space<vmem>>, vector<1x8x64xf32>,
    return
  }
  func.func @transform_0(%arg0: i32) -> (i32, i32, i32) {
    %c0_i32 = arith.constant 0 : i32
    %c0_i32_0 = arith.constant 0 : i32
    %c0_i32_1 = arith.constant 0 : i32
    return %arg0, %c0_i32, %c0_i32_0 : i32, i32, i32
  }
  func.func @transform_1(%arg0: i32) -> (i32, i32) {
    %c0_i32 = arith.constant 0 : i32
    %c0_i32_0 = arith.constant 0 : i32
    %c0_i32_1 = arith.constant 0 : i32
    return %c0_i32, %c0_i32_0 : i32, i32
  }
  func.func @transform_2(%arg0: i32) -> (i32, i32) {
    %c0_i32 = arith.constant 0 : i32
    %c0_i32_0 = arith.constant 0 : i32
    %c0_i32_1 = arith.constant 0 : i32
    return %c0_i32, %c0_i32_0 : i32, i32
  }
  func.func @transform_3(%arg0: i32) -> (i32, i32) {
    %c0_i32 = arith.constant 0 : i32
    %c0_i32_0 = arith.constant 0 : i32
    %c0_i32_1 = arith.constant 0 : i32
    return %c0_i32, %c0_i32_0 : i32, i32
  }
  func.func @transform_4(%arg0: i32) -> (i32, i32, i32) {
    %c0_i32 = arith.constant 0 : i32
    %c0_i32_0 = arith.constant 0 : i32
    %c0_i32_1 = arith.constant 0 : i32
    return %arg0, %c0_i32, %c0_i32_0 : i32, i32, i32
  }
}

</mosaic_0001>

<bundles_post_ra>
// kernel: _conv_block_share_batched.1
= control target key start
LH: loop header
LB: loop body
LE: loop exit
PB: predicated region body
PF: predicated region fallthrough
CT: control target
= control target key end

     0   :  { %s444_s15 = smov 0   ;;  %s478_s0 = inlined_call_operand.vmem [shape: bf16[4,64,64], index: 0, kind: input, shape index: {}]   ;;  %s479_s1 = inlined_call_operand.vmem [shape: bf16[8,64], index: 1, kind: input, shape index: {}]   ;;  %s480_s2 = inlined_call_operand.vmem [shape: f32[8,1], index: 2, kind: input, shape index: {}]   ;;  %s481_s3 = inlined_call_operand.vmem [shape: f32[8,1], index: 3, kind: input, shape index: {}]   ;;  %s482_s4 = inlined_call_operand.vmem [shape: f32[4,8,64], index: 4, kind: output, shape index: {}]  }
   0x1 LB: > { %s356_s16 = sadd.s32 4294967295, %s414_s15   ;;  %p360_p0 = scmp.ge.s32.totalorder %s414_s15, 1  ;;  %s414_s15 = sphi %s444_s15, %s14_s15  }
   0x2   : > { %p162_p1 = scmp.lt.s32.totalorder %s414_s15, 5 }
   0x4   : > { %p163_p2 = pnand %p360_p0, %p162_p1 }
   0x5   : > { %p187_p3 = scmp.lt.s32.totalorder (!%p163_p2), %s356_s16, 3 }
   0x6   : > { %166 = sbr.rel (%p163_p2) target bundleno = 532 (0x214), region = 36 }
   0xb   : > { %v416_v0 = vmov 0.0   ;;  %vm417_vm0 = vmmov 0   ;;  %s484_s16 = smov (!%p187_p3, %s356_s16), 3  ;;  %v197_v5 = vld [vmem:[%s479_s1] sm:$0xf]  ;;  %vm230_vm1 = vcmask 523264  }
   0xc   : > { %377 = vmatprep.subr.bf16.mxu0 %v416_v0  ;;  %385 = vmatprep.mubr.msk.bf16.mxu0 %vm417_vm0, %v416_v0  ;;  %s371_s17 = sshll.u32 %s484_s16, 5  ;;  %v288_v11 = vld [vmem:[%s480_s2] sm:$0xff]  ;;  %v418_v12 = vmov 0   ;;  %s363_s27 = sshll.u32 %s484_s16, 3 }
   0xd   : > { %s191_s20 = scalar_lea.vmem %s478_s0, %s371_s17  ;;  %400 = vset.pattern.permute.xlu1 %v418_v12  ;;  %401 = vset.pattern.permute.xlu0 %v418_v12  ;;  %v295_v13 = vld [vmem:[%s481_s3] sm:$0xff]  ;;  %s195_s30 = scalar_lea.vmem %s482_s4, %s363_s27 }
   0xe   : > { %v402_v1 = vld [vmem:[%s191_s20 + $0x18] sm:$0xff]   ;;  %v403_v2 = vld [vmem:[%s191_s20 + $0x10] sm:$0xff]   ;;  %v404_v3 = vld [vmem:[%s191_s20 + $0x8] sm:$0xff]   ;;  %291 = vperm.xlu1 %400, %v288_v11  }
   0xf   : > { %378 = vmatpush3.bf16.msra.mxu0 %v402_v1  ;;  %v405_v4 = vld [vmem:[%s191_s20] sm:$0xff]  }
  0x10   : > { %379 = vmatprep.subr.bf16.mxu0 %v416_v0 }
  0x12   : > { %298 = vperm.xlu1 %400, %v295_v13  }
  0x13   : > { %380 = vmatpush3.bf16.msra.mxu0 %v403_v2 }
  0x14   : > { %381 = vmatprep.subr.bf16.mxu0 %v416_v0 }
  0x17   : > { %382 = vmatpush3.bf16.msra.mxu0 %v404_v3 }
  0x18   : > { %383 = vmatprep.subr.bf16.mxu0 %v416_v0 }
  0x1b   : > { %384 = vmatpush3.bf16.msra.mxu0 %v405_v4 }
  0x1e   : > { %386 = vmatmul.mubr.msk.bf16.vlgmr.msra.gmra.mxu0 %vm230_vm1, %v197_v5 }
  0x89   : > { %v292_v22 = vpop.permute.xlu1 %291 }
  0x8d   : > { %v299_v26 = vpop.permute.xlu1 %298 }
  0xde   : > { %v268_v6 = vpop.f32.mrf.mxu0 }
  0xdf   : > { %v274_v7 = vsel %vm230_vm1, %v268_v6, 0.0 }
  0xe0   : > { %275 = vadd.xlane.f32.xlu0 %v274_v7  ;;  %v387_v8 = vpop.f32.mrf.mxu0 }
  0xe2   : > { %v271_v9 = vpop.f32.mrf.mxu0 }
  0xe4   : > { %v388_v10 = vpop.f32.mrf.mxu0 }
 0x169   : > { %v276_v14 = vpop.xlane.xlu0 %275 }
 0x16a   : > { %v278_v15 = vmul.f32 0.015625, %v276_v14 }
 0x16c   : > { %v279_v16 = vsub.f32 %v268_v6, %v278_v15 }
 0x16e   : > { %v280_v17 = vmul.f32 %v279_v16, %v279_v16 }
 0x170   : > { %v281_v18 = vsel %vm230_vm1, %v280_v17, 0.0 }
 0x171   : > { %282 = vadd.xlane.f32.xlu0 %v281_v18 }
 0x1fa   : > { %v283_v19 = vpop.xlane.xlu0 %282 }
 0x1fb   : > { %v284_v20 = vmul.f32 0.015625, %v283_v19 }
 0x1fd   : > { %v285_v21 = vadd.f32 1e-05, %v284_v20 }
 0x1ff   : > { %406 = vrsqrt.f32 %v285_v21 }
 0x20c   : > { %v407_v23 = vpop.eup %406 }
 0x20d   : > { %v287_v24 = vmul.f32 %v407_v23, %v279_v16 }
 0x20f   : > { %v294_v25 = vmul.f32 %v292_v22, %v287_v24 }
 0x211   : > { %v301_v27 = vadd.f32 %v299_v26, %v294_v25 }
 0x213   : > { %302 = vst.msk [vmem:[%s195_s30] sm:$0xff] %vm230_vm1, %v301_v27 }
 0x214 PF: > { %s14_s15 = sadd.s32 1, %s414_s15  }
 0x215   : > { %p11_p4 = scmp.ge.s32.totalorder %s14_s15, 6  }
 0x217   :  { %13 = sbr.rel (!%p11_p4) target bundleno = 1 (0x1), region = 66 }

</bundles_post_ra>
